<compile_context>
chip_gen: v7x
topology: tpu7x:2x2x1
jax: 0.10.0
libtpu: 0.0.40
codegen_flags: <defaults>
</compile_context>

<pallas_src>
import functools

import jax
import jax.numpy as jnp
from jax import lax
from jax.experimental import pallas as pl
from jax.experimental.pallas import tpu as pltpu


def _round_up(x, m):
    return ((x + m - 1) // m) * m


def _tpu_config():
    """Best-effort chip-generation detection -> (bn_cap, vmem_limit, num_cores)."""
    try:
        kind = jax.devices()[0].device_kind.lower()
    except Exception:  # no device info available -> conservative defaults
        kind = ""
    is_v7x = ("v7" in kind) or ("7x" in kind)
    is_old = ("v2" in kind) or ("v3" in kind)
    multi_core = is_v7x or ("v4" in kind) or ("v5p" in kind)

    if is_v7x:
        bn_cap, vmem_limit = 16384, 48 * 1024 * 1024   # 64 MiB physical VMEM
    elif is_old:
        bn_cap, vmem_limit = 4096, 12 * 1024 * 1024    # tiny VMEM on v2/v3
    elif kind:
        bn_cap, vmem_limit = 16384, 64 * 1024 * 1024   # v4/v5e/v5p/v6e: 128 MiB
    else:
        bn_cap, vmem_limit = 16384, 48 * 1024 * 1024   # unknown -> v7x-safe
    return bn_cap, vmem_limit, (2 if multi_core else 1)


def _pick_tile(n, block_n, bn_cap, num_cores):
    """Batch tile (multiple of 128).  On multi-core chips keep the step count a
    multiple of the core count so both TensorCores get balanced work."""
    n128 = _round_up(max(n, 1), 128)
    bn = max(128, min(_round_up(block_n, 128), _round_up(bn_cap, 128), n128))
    if num_cores > 1:
        steps = pl.cdiv(n128, bn)
        tgt = _round_up(steps, num_cores)
        if tgt != steps and n128 >= 128 * tgt:
            bn = _round_up(pl.cdiv(n128, tgt), 128)
    return bn


def _mlp_kernel(x_ref, w1_ref, b1_ref, w2_ref, b2_ref, w3_ref, b3_ref, o_ref,
                *, compute_dtype):
    """One batch tile.  x_ref is (bn, in_dim) in natural layout; every layer is
    computed as W @ X^T so the batch lives on the lane axis throughout."""
    x = x_ref[...].astype(compute_dtype)                               # (bn, in)

    # Layer 1: NT matmul -> (hid, bn); f32 accumulation, bias/ReLU in f32.
    h1 = lax.dot_general(w1_ref[...], x, (((1,), (1,)), ((), ())),
                         preferred_element_type=jnp.float32)           # (h, bn)
    h1 = jnp.maximum(h1 + b1_ref[...], 0.0).astype(compute_dtype)

    # Layer 2: Linear + ReLU.
    h2 = jnp.dot(w2_ref[...], h1, preferred_element_type=jnp.float32)  # (2h, bn)
    h2 = jnp.maximum(h2 + b2_ref[...], 0.0).astype(compute_dtype)

    # Layer 3: Linear (no activation); output tile (out_dim, bn) is lane-dense.
    out = jnp.dot(w3_ref[...], h2, preferred_element_type=jnp.float32)  # (o, bn)
    o_ref[...] = (out + b3_ref[...]).astype(o_ref.dtype)


@functools.partial(jax.jit,
                   static_argnames=("block_n", "compute_dtype", "transpose_output"))
def implicit_mlp_forward(x, params, block_n=16384, compute_dtype=jnp.float32,
                         transpose_output=True):
    """x: (N, input_dim). params: PyTorch-layout weights w_k (out, in), b_k (out, 1).

    Returns (N, output_dim) (or the lane-dense (output_dim, N) slab when
    transpose_output=False) in x.dtype.
    """
    w1, b1 = params["w1"], params["b1"]
    w2, b2 = params["w2"], params["b2"]
    w3, b3 = params["w3"], params["b3"]

    n, in_dim = x.shape
    hid, hid2, out_dim = w1.shape[0], w2.shape[0], w3.shape[0]
    out_dtype = x.dtype
    f32 = jnp.float32

    # ---- batch-tile selection (batch lives on the lane axis -> multiple of 128) ----
    bn_cap, vmem_limit, num_cores = _tpu_config()
    bn = _pick_tile(n, block_n, bn_cap, num_cores)
    n_pad = bn * pl.cdiv(n, bn)
    grid = (n_pad // bn,)

    # ---- operand prep: x untouched (padded along batch only if needed); MXU
    # weight operands cast to compute_dtype; biases stay f32. ----
    # TODO(synk): rely on Pallas masked edge blocks instead of this pad to also
    # drop the copy when N is not a tile multiple.
    x_in = jnp.pad(x, ((0, n_pad - n), (0, 0))) if n_pad != n else x
    w1c, w2c, w3c = (w.astype(compute_dtype) for w in (w1, w2, w3))
    b1f, b2f, b3f = (b.astype(f32) for b in (b1, b2, b3))

    # Weights/biases: full-array blocks, same block every grid step (resident in
    # VMEM across the grid).
    # TODO(synk): pipeline_mode=pl.Buffered(1) would drop their redundant double
    # buffer (~20 KiB); left at the default for lowering safety.
    full = lambda shp: pl.BlockSpec(shp, lambda i: (0, 0))

    flops = 2 * n_pad * (in_dim * hid + hid * hid2 + hid2 * out_dim)
    bytes_accessed = (x_in.size * x_in.dtype.itemsize
                      + out_dim * n_pad * jnp.dtype(out_dtype).itemsize
                      + sum(a.size * a.dtype.itemsize
                            for a in (w1c, b1f, w2c, b2f, w3c, b3f)))

    out_t = pl.pallas_call(
        functools.partial(_mlp_kernel, compute_dtype=compute_dtype),
        out_shape=jax.ShapeDtypeStruct((out_dim, n_pad), out_dtype),
        grid_spec=pltpu.PrefetchScalarGridSpec(
            num_scalar_prefetch=0,
            grid=grid,
            in_specs=[
                pl.BlockSpec((bn, in_dim), lambda i: (i, 0)),  # x row tile
                full((hid, in_dim)),     # w1
                full((hid, 1)),          # b1
                full((hid2, hid)),       # w2
                full((hid2, 1)),         # b2
                full((out_dim, hid2)),   # w3
                full((out_dim, 1)),      # b3
            ],
            out_specs=pl.BlockSpec((out_dim, bn), lambda i: (0, i)),
        ),
        compiler_params=pltpu.CompilerParams(
            dimension_semantics=("parallel",),
            vmem_limit_bytes=vmem_limit,
        ),
        cost_estimate=pl.CostEstimate(flops=flops, transcendentals=0,
                                      bytes_accessed=bytes_accessed),
    )(x_in, w1c, b1f, w2c, b2f, w3c, b3f)

    out_t = out_t[:, :n] if n_pad != n else out_t
    # Cheap wrapper transpose (out_dim is tiny); skip it with transpose_output=False.
    return out_t.T if transpose_output else out_t


def init_params(key, input_dim, hidden_dim, output_dim, dtype=jnp.float32):
    """PyTorch-layout parameters: W (out_features, in_features), b (out_features, 1)."""
    ks = jax.random.split(key, 6)

    def linear(kw, kb, fan_in, fan_out):
        bound = float(fan_in) ** -0.5   # PyTorch default U(-1/sqrt(fan_in), 1/sqrt(fan_in))
        w = jax.random.uniform(kw, (fan_out, fan_in), dtype, -bound, bound)
        b = jax.random.uniform(kb, (fan_out, 1), dtype, -bound, bound)
        return w, b

    w1, b1 = linear(ks[0], ks[1], input_dim, hidden_dim)
    w2, b2 = linear(ks[2], ks[3], hidden_dim, hidden_dim * 2)
    w3, b3 = linear(ks[4], ks[5], hidden_dim * 2, output_dim)
    return {"w1": w1, "b1": b1, "w2": w2, "b2": b2, "w3": w3, "b3": b3}


def reference_forward(x, p, compute_dtype=jnp.float32):
    """Pure-JAX reference mirroring the kernel's dtype handling (f32 accumulation)."""
    f32 = jnp.float32
    hp = jax.lax.Precision.HIGHEST

    def dense(h, w, b):
        h = h.astype(compute_dtype).astype(f32)
        w = w.astype(compute_dtype).astype(f32)
        return jnp.dot(h, w.T, precision=hp) + b[:, 0].astype(f32)

    h1 = jnp.maximum(dense(x, p["w1"], p["b1"]), 0.0)
    h2 = jnp.maximum(dense(h1, p["w2"], p["b2"]), 0.0)
    return dense(h2, p["w3"], p["b3"])


if __name__ == "__main__":
    # Small, forward-consistent shapes: N points, each a flattened feature+position vector.
    N, INPUT_DIM, HIDDEN_DIM, OUTPUT_DIM = 256, 6, 32, 4

    key = jax.random.PRNGKey(0)
    kx, kx2, kp = jax.random.split(key, 3)
    x = jax.random.normal(kx, (N, INPUT_DIM), jnp.float32)
    params = init_params(kp, INPUT_DIM, HIDDEN_DIM, OUTPUT_DIM)

    # Default f32 path (tight correctness check vs. the reference MLP).
    out_f32 = jax.block_until_ready(implicit_mlp_forward(x, params))
    ref_f32 = reference_forward(x, params, compute_dtype=jnp.float32)
    assert out_f32.shape == (N, OUTPUT_DIM), out_f32.shape
    assert jnp.allclose(out_f32, ref_f32, atol=1e-4, rtol=1e-4), \
        float(jnp.max(jnp.abs(out_f32 - ref_f32)))

    # Ragged batch (exercises pad/slice path) + bf16 MXU-operand opt-in.
    N2 = 300
    x2 = jax.random.normal(kx2, (N2, INPUT_DIM), jnp.float32)
    out_bf16 = jax.block_until_ready(
        implicit_mlp_forward(x2, params, compute_dtype=jnp.bfloat16))
    ref_bf16 = reference_forward(x2, params, compute_dtype=jnp.bfloat16)
    assert out_bf16.shape == (N2, OUTPUT_DIM), out_bf16.shape
    assert jnp.allclose(out_bf16, ref_bf16, atol=2e-2, rtol=2e-2), \
        float(jnp.max(jnp.abs(out_bf16 - ref_bf16)))

    print("KERNEL_OK")
</pallas_src>

<mosaic_0001>
module attributes {stable_mosaic.version = 11 : i64} {
  func.func @_mlp_kernel(%arg0: i32, %arg1: memref<256x6xf32, #tpu.memory_space<vmem>>, %arg2: memref<32x6xf32, #tpu.memory_space<vmem>>, %arg3: memref<32x1xf32, #tpu.memory_space<vmem>>, %arg4: memref<64x32xf32, #tpu.memory_space<vmem>>, %arg5: memref<64x1xf32, #tpu.memory_space<vmem>>, %arg6: memref<4x64xf32, #tpu.memory_space<vmem>>, %arg7: memref<4x1xf32, #tpu.memory_space<vmem>>, %arg8: memref<4x256xf32, #tpu.memory_space<vmem>>) attributes {dimension_semantics = [#tpu.dimension_semantics<parallel>], iteration_bounds = array<i64: 1>, scalar_prefetch = 0 : i64, scratch_operands = 0 : i64, tpu.core_type = #tpu.core_type<tc>, window_params = [{transform_indices = @transform_0, window_bounds = array<i64: 256, 6>}, {pipeline_mode = #tpu.pipeline_mode<synchronous>, transform_indices = @transform_1, window_bounds = array<i64: 32, 6>}, {pipeline_mode = #tpu.pipeline_mode<synchronous>, transform_indices = @transform_2, window_bounds = array<i64: 32, 1>}, {pipeline_mode = #tpu.pipeline_mode<synchronous>, transform_indices = @transform_3, window_bounds = array<i64: 64, 32>}, {pipeline_mode = #tpu.pipeline_mode<synchronous>, transform_indices = @transform_4, window_bounds = array<i64: 64, 1>}, {pipeline_mode = #tpu.pipeline_mode<synchronous>, transform_indices = @transform_5, window_bounds = array<i64: 4, 64>}, {pipeline_mode = #tpu.pipeline_mode<synchronous>, transform_indices = @transform_6, window_bounds = array<i64: 4, 1>}, {transform_indices = @transform_7, window_bounds = array<i64: 4, 256>}]} {
    %c0 = arith.constant 0 : index
    %c0_0 = arith.constant 0 : index
    %0 = vector.load %arg1[%c0, %c0_0] : memref<256x6xf32, #tpu.memory_space<vmem>>, vector<256x6xf32>
    %c0_1 = arith.constant 0 : index
    %c0_2 = arith.constant 0 : index
    %1 = vector.load %arg2[%c0_1, %c0_2] : memref<32x6xf32, #tpu.memory_space<vmem>>, vector<32x6xf32>
    %cst = arith.constant dense<0.000000e+00> : vector<32x256xf32>
    %2 = tpu.matmul %1, %0, %cst {dimension_numbers = #tpu.dot_dimension_numbers<[1], [1], [0], [0], [0, 0, 1, 0], [], []>} : vector<32x6xf32>, vector<256x6xf32>, vector<32x256xf32> -> vector<32x256xf32>
    %c0_3 = arith.constant 0 : index
    %c0_4 = arith.constant 0 : index
    %3 = vector.load %arg3[%c0_3, %c0_4] : memref<32x1xf32, #tpu.memory_space<vmem>>, vector<32x1xf32>
    %4 = vector.broadcast %3 : vector<32x1xf32> to vector<32x256xf32>
    %5 = arith.addf %2, %4 : vector<32x256xf32>
    %cst_5 = arith.constant 0.000000e+00 : f32
    %6 = vector.broadcast %cst_5 : f32 to vector<32x256xf32>
    %7 = arith.maximumf %5, %6 : vector<32x256xf32>
    %c0_6 = arith.constant 0 : index
    %c0_7 = arith.constant 0 : index
    %8 = vector.load %arg4[%c0_6, %c0_7] : memref<64x32xf32, #tpu.memory_space<vmem>>, vector<64x32xf32>
    %cst_8 = arith.constant dense<0.000000e+00> : vector<64x256xf32>
    %9 = tpu.matmul %8, %7, %cst_8 {dimension_numbers = #tpu.dot_dimension_numbers<[1], [0], [0], [1], [0, 0, 1, 1], [], []>} : vector<64x32xf32>, vector<32x256xf32>, vector<64x256xf32> -> vector<64x256xf32>
    %c0_9 = arith.constant 0 : index
    %c0_10 = arith.constant 0 : index
    %10 = vector.load %arg5[%c0_9, %c0_10] : memref<64x1xf32, #tpu.memory_space<vmem>>, vector<64x1xf32>
    %11 = vector.broadcast %10 : vector<64x1xf32> to vector<64x256xf32>
    %12 = arith.addf %9, %11 : vector<64x256xf32>
    %cst_11 = arith.constant 0.000000e+00 : f32
    %13 = vector.broadcast %cst_11 : f32 to vector<64x256xf32>
    %14 = arith.maximumf %12, %13 : vector<64x256xf32>
    %c0_12 = arith.constant 0 : index
    %c0_13 = arith.constant 0 : index
    %15 = vector.load %arg6[%c0_12, %c0_13] : memref<4x64xf32, #tpu.memory_space<vmem>>, vector<4x64xf32>
    %cst_14 = arith.constant dense<0.000000e+00> : vector<4x256xf32>
    %16 = tpu.matmul %15, %14, %cst_14 {dimension_numbers = #tpu.dot_dimension_numbers<[1], [0], [0], [1], [0, 0, 1, 1], [], []>} : vector<4x64xf32>, vector<64x256xf32>, vector<4x256xf32> -> vector<4x256xf32>
    %c0_15 = arith.constant 0 : index
    %c0_16 = arith.constant 0 : index
    %17 = vector.load %arg7[%c0_15, %c0_16] : memref<4x1xf32, #tpu.memory_space<vmem>>, vector<4x1xf32>
    %18 = vector.broadcast %17 : vector<4x1xf32> to vector<4x256xf32>
    %19 = arith.addf %16, %18 : vector<4x256xf32>
    %c0_17 = arith.constant 0 : index
    %c0_18 = arith.constant 0 : index
    %20 = vector.load %arg8[%c0_17, %c0_18] : memref<4x256xf32, #tpu.memory_space<vmem>>, vector<4x256xf32>
    tpu.vector_store %arg8[%c0_17, %c0_18], %19 {strides = array<i32>} : memref<4x256xf32, #tpu.memory_space<vmem>>, vector<4x256xf32>,
    return
  }
  func.func @transform_0(%arg0: i32) -> (i32, i32) {
    %c0_i32 = arith.constant 0 : i32
    %c0_i32_0 = arith.constant 0 : i32
    return %arg0, %c0_i32 : i32, i32
  }
  func.func @transform_1(%arg0: i32) -> (i32, i32) {
    %c0_i32 = arith.constant 0 : i32
    %c0_i32_0 = arith.constant 0 : i32
    %c0_i32_1 = arith.constant 0 : i32
    return %c0_i32, %c0_i32_0 : i32, i32
  }
  func.func @transform_2(%arg0: i32) -> (i32, i32) {
    %c0_i32 = arith.constant 0 : i32
    %c0_i32_0 = arith.constant 0 : i32
    %c0_i32_1 = arith.constant 0 : i32
    return %c0_i32, %c0_i32_0 : i32, i32
  }
  func.func @transform_3(%arg0: i32) -> (i32, i32) {
    %c0_i32 = arith.constant 0 : i32
    %c0_i32_0 = arith.constant 0 : i32
    %c0_i32_1 = arith.constant 0 : i32
    return %c0_i32, %c0_i32_0 : i32, i32
  }
  func.func @transform_4(%arg0: i32) -> (i32, i32) {
    %c0_i32 = arith.constant 0 : i32
    %c0_i32_0 = arith.constant 0 : i32
    %c0_i32_1 = arith.constant 0 : i32
    return %c0_i32, %c0_i32_0 : i32, i32
  }
  func.func @transform_5(%arg0: i32) -> (i32, i32) {
    %c0_i32 = arith.constant 0 : i32
    %c0_i32_0 = arith.constant 0 : i32
    %c0_i32_1 = arith.constant 0 : i32
    return %c0_i32, %c0_i32_0 : i32, i32
  }
  func.func @transform_6(%arg0: i32) -> (i32, i32) {
    %c0_i32 = arith.constant 0 : i32
    %c0_i32_0 = arith.constant 0 : i32
    %c0_i32_1 = arith.constant 0 : i32
    return %c0_i32, %c0_i32_0 : i32, i32
  }
  func.func @transform_7(%arg0: i32) -> (i32, i32) {
    %c0_i32 = arith.constant 0 : i32
    %c0_i32_0 = arith.constant 0 : i32
    return %c0_i32, %arg0 : i32, i32
  }
}

</mosaic_0001>

<bundles_post_ra>
// kernel: implicit_mlp_forward.1
= control target key start
LH: loop header
LB: loop body
LE: loop exit
PB: predicated region body
PF: predicated region fallthrough
CT: control target
= control target key end

     0   :  { %12 = vsyncpa [#allocation3], 0  ;;  %s1298_s0 = inlined_call_operand.hbm [shape: f32[256,6], index: 0, kind: input, shape index: {}]   ;;  %s1299_s1 = inlined_call_operand.hbm [shape: f32[32,6], index: 1, kind: input, shape index: {}]   ;;  %s1300_s2 = inlined_call_operand.hbm [shape: f32[32,1], index: 2, kind: input, shape index: {}]   ;;  %s1301_s3 = inlined_call_operand.hbm [shape: f32[64,32], index: 3, kind: input, shape index: {}]   ;;  %s1302_s4 = inlined_call_operand.hbm [shape: f32[64,1], index: 4, kind: input, shape index: {}]   ;;  %s1303_s5 = inlined_call_operand.hbm [shape: f32[4,64], index: 5, kind: input, shape index: {}]   ;;  %s1304_s6 = inlined_call_operand.hbm [shape: f32[4,1], index: 6, kind: input, shape index: {}]   ;;  %s1305_s7 = inlined_call_operand.hbm [shape: f32[4,256], index: 7, kind: output, shape index: {}]  }
   0x1   :  { %13 = vsyncpa [#allocation6], 0 }
   0x2   :  { %14 = vsyncpa [#allocation9], 0 }
   0x3   :  { %15 = vsyncpa [#allocation12], 0 }
   0x4   :  { %16 = vsyncpa [#allocation4], 0  ;;  %s1056_s24 = smov [#allocation5]   ;;  %s1057_s26 = smov [#allocation8]  }
   0x5   :  { %s34_s25 = sshll.u32 %s1056_s24, 4  ;;  %s58_s27 = sshll.u32 %s1057_s26, 4  ;;  %s35_s25 = int_to_ptr.vmem [resolvable:$true] %s34_s25  ;;  %s1108_s27 = int_to_ptr.vmem [resolvable:$true] %s58_s27 }
   0x6   :  { %s870_s30 = scalar_lea.hbm %s1299_s1, 512 }
   0x7   :  { %p871_p0 = scmp.ne.s32.totalorder %s1299_s1, %s870_s30  ;;  %p874_p1 = scmp.lt.u32.totalorder %s870_s30, %s1299_s1 }
   0x9   :  { %p876_p2 = pnand %p874_p1, %p871_p0 }
   0xb   :  { %879 = shalt.err (!%p876_p2)
}
   0xc   :  { %s880_s12 = scalar_lea.vmem %s35_s25, 512  ;;  %p885_p4 = scmp.lt.s32.totalorder %s35_s25, %s35_s25 }
   0xd   :  { %p881_p3 = scmp.ne.s32.totalorder %s35_s25, %s880_s12  ;;  %p886_p5 = scmp.lt.s32.totalorder %s880_s12, %s880_s12 }
   0xf   :  { %p887_p6 = por %p886_p5, %p885_p4 }
  0x11   :  { %p888_p7 = pnand %p887_p6, %p881_p3 }
  0x13   :  { %891 = shalt.err (!%p888_p7)
}
  0x14   :  { %s1058_s13 = smov 128   ;;  %s1059_s14 = smov 8  }
  0x15   :  { %40 = dma.hbm_to_vmem [thread:$0]  %s1299_s1, 512, %s35_s25, [#allocation6], %s1058_s13, %s1058_s13, %s1059_s14  }
  0x16   :  { %s892_s19 = scalar_lea.hbm %s1301_s3, 1024 }
  0x17   :  { %p893_p8 = scmp.ne.s32.totalorder %s1301_s3, %s892_s19  ;;  %p896_p9 = scmp.lt.u32.totalorder %s892_s19, %s1301_s3 }
  0x19   :  { %p898_p10 = pnand %p896_p9, %p893_p8 }
  0x1b   :  { %901 = shalt.err (!%p898_p10)
}
  0x1c   :  { %s902_s24 = scalar_lea.vmem %s1108_s27, 1024  ;;  %p907_p12 = scmp.lt.s32.totalorder %s1108_s27, %s1108_s27 }
  0x1d   :  { %p903_p11 = scmp.ne.s32.totalorder %s1108_s27, %s902_s24  ;;  %p908_p13 = scmp.lt.s32.totalorder %s902_s24, %s902_s24 }
  0x1f   :  { %p909_p0 = por %p908_p13, %p907_p12 }
  0x21   :  { %p910_p1 = pnand %p909_p0, %p903_p11 }
  0x23   :  { %913 = shalt.err (!%p910_p1)
}
  0x24   :  { %64 = dma.hbm_to_vmem [thread:$0]  %s1301_s3, 1024, %s1108_s27, [#allocation9], %s1058_s13, %s1058_s13, %s1059_s14  }
  0x25   :  { %s1060_s26 = smov [#allocation11]   ;;  %s1061_s29 = smov [#allocation2]  }
  0x26   :  { %s83_s28 = sshll.u32 %s1060_s26, 4  ;;  %s22_s30 = sshll.u32 %s1061_s29, 4  ;;  %s84_s28 = int_to_ptr.vmem [resolvable:$true] %s83_s28  ;;  %s1145_s30 = int_to_ptr.vmem [resolvable:$true] %s22_s30 }
  0x27   :  { %s914_s10 = scalar_lea.hbm %s1303_s5, 64 }
  0x28   :  { %p915_p2 = scmp.ne.s32.totalorder %s1303_s5, %s914_s10  ;;  %p918_p3 = scmp.lt.u32.totalorder %s914_s10, %s1303_s5 }
  0x2a   :  { %p920_p4 = pnand %p918_p3, %p915_p2 }
  0x2c   :  { %923 = shalt.err (!%p920_p4)
}
  0x2d   :  { %s924_s3 = scalar_lea.vmem %s84_s28, 64  ;;  %p929_p6 = scmp.lt.s32.totalorder %s84_s28, %s84_s28 }
  0x2e   :  { %p925_p5 = scmp.ne.s32.totalorder %s84_s28, %s924_s3  ;;  %p930_p7 = scmp.lt.s32.totalorder %s924_s3, %s924_s3 }
  0x30   :  { %p931_p8 = por %p930_p7, %p929_p6 }
  0x32   :  { %p932_p9 = pnand %p931_p8, %p925_p5 }
  0x34   :  { %935 = shalt.err (!%p932_p9)
}
  0x35   :  { %86 = dma.hbm_to_vmem [thread:$0]  %s1303_s5, 64, %s84_s28, [#allocation12]  }
  0x36   :  { %s936_s20 = scalar_lea.hbm %s1298_s0, 4096 }
  0x37   :  { %p937_p10 = scmp.ne.s32.totalorder %s1298_s0, %s936_s20  ;;  %p940_p11 = scmp.lt.u32.totalorder %s936_s20, %s1298_s0 }
  0x39   :  { %p942_p12 = pnand %p940_p11, %p937_p10 }
  0x3b   :  { %945 = shalt.err (!%p942_p12)
}
  0x3c   :  { %s946_s1 = scalar_lea.vmem %s1145_s30, 4096  ;;  %p951_p0 = scmp.lt.s32.totalorder %s1145_s30, %s1145_s30 }
  0x3d   :  { %p947_p13 = scmp.ne.s32.totalorder %s1145_s30, %s946_s1  ;;  %p952_p1 = scmp.lt.s32.totalorder %s946_s1, %s946_s1 }
  0x3f   :  { %p953_p2 = por %p952_p1, %p951_p0 }
  0x41   :  { %p954_p3 = pnand %p953_p2, %p947_p13 }
  0x43   :  { %957 = shalt.err (!%p954_p3)
}
  0x44   :  { %28 = dma.hbm_to_vmem [thread:$0]  %s1298_s0, 4096, %s1145_s30, [#allocation3], %s1058_s13, %s1058_s13, %s1059_s14  }
  0x45   :  { %s1062_s26 = smov [#allocation7]   ;;  %s1063_s29 = smov [#allocation10]  }
  0x46   :  { %s46_s28 = sshll.u32 %s1062_s26, 4  ;;  %s70_s8 = sshll.u32 %s1063_s29, 4  ;;  %s47_s28 = int_to_ptr.vmem [resolvable:$true] %s46_s28  ;;  %s1179_s8 = int_to_ptr.vmem [resolvable:$true] %s70_s8 }
  0x47   :  { %s958_s11 = scalar_lea.hbm %s1300_s2, 512 }
  0x48   :  { %p959_p4 = scmp.ne.s32.totalorder %s1300_s2, %s958_s11  ;;  %p962_p5 = scmp.lt.u32.totalorder %s958_s11, %s1300_s2 }
  0x4a   :  { %p964_p6 = pnand %p962_p5, %p959_p4 }
  0x4c   :  { %967 = shalt.err (!%p964_p6)
}
  0x4d   :  { %s968_s0 = scalar_lea.vmem %s47_s28, 512  ;;  %p973_p8 = scmp.lt.s32.totalorder %s47_s28, %s47_s28 }
  0x4e   :  { %p969_p7 = scmp.ne.s32.totalorder %s47_s28, %s968_s0  ;;  %p974_p9 = scmp.lt.s32.totalorder %s968_s0, %s968_s0 }
  0x50   :  { %p975_p10 = por %p974_p9, %p973_p8 }
  0x52   :  { %p976_p11 = pnand %p975_p10, %p969_p7 }
  0x54   :  { %979 = shalt.err (!%p976_p11)
}
  0x55   :  { %52 = dma.hbm_to_vmem [thread:$0]  %s1300_s2, 512, %s47_s28, [#allocation6], %s1058_s13, %s1058_s13, %s1059_s14  }
  0x56   :  { %s980_s19 = scalar_lea.hbm %s1302_s4, 1024 }
  0x57   :  { %p981_p12 = scmp.ne.s32.totalorder %s1302_s4, %s980_s19  ;;  %p984_p13 = scmp.lt.u32.totalorder %s980_s19, %s1302_s4 }
  0x59   :  { %p986_p0 = pnand %p984_p13, %p981_p12 }
  0x5b   :  { %989 = shalt.err (!%p986_p0)
}
  0x5c   :  { %s990_s24 = scalar_lea.vmem %s1179_s8, 1024  ;;  %p995_p2 = scmp.lt.s32.totalorder %s1179_s8, %s1179_s8 }
  0x5d   :  { %p991_p1 = scmp.ne.s32.totalorder %s1179_s8, %s990_s24  ;;  %p996_p3 = scmp.lt.s32.totalorder %s990_s24, %s990_s24 }
  0x5f   :  { %p997_p4 = por %p996_p3, %p995_p2 }
  0x61   :  { %p998_p5 = pnand %p997_p4, %p991_p1 }
  0x63   :  { %1001 = shalt.err (!%p998_p5)
}
  0x64   :  { %76 = dma.hbm_to_vmem [thread:$0]  %s1302_s4, 1024, %s1179_s8, [#allocation9], %s1058_s13, %s1058_s13, %s1059_s14  }
  0x65   :  { %s1064_s5 = smov [#allocation13]   ;;  %s1002_s29 = scalar_lea.hbm %s1304_s6, 64 }
  0x66   :  { %s93_s25 = sshll.u32 %s1064_s5, 4  ;;  %p1003_p6 = scmp.ne.s32.totalorder %s1304_s6, %s1002_s29  ;;  %s94_s25 = int_to_ptr.vmem [resolvable:$true] %s93_s25 }
  0x67   :  { %p1006_p7 = scmp.lt.u32.totalorder %s1002_s29, %s1304_s6 }
  0x69   :  { %p1008_p8 = pnand %p1006_p7, %p1003_p6 }
  0x6b   :  { %1011 = shalt.err (!%p1008_p8)
}
  0x6c   :  { %s1012_s15 = scalar_lea.vmem %s94_s25, 64  ;;  %p1017_p10 = scmp.lt.s32.totalorder %s94_s25, %s94_s25 }
  0x6d   :  { %p1013_p9 = scmp.ne.s32.totalorder %s94_s25, %s1012_s15  ;;  %p1018_p11 = scmp.lt.s32.totalorder %s1012_s15, %s1012_s15 }
  0x6f   :  { %p1019_p12 = por %p1018_p11, %p1017_p10 }
  0x71   :  { %p1020_p13 = pnand %p1019_p12, %p1013_p9 }
  0x73   :  { %1023 = shalt.err (!%p1020_p13)
}
  0x74   :  { %96 = dma.hbm_to_vmem [thread:$0]  %s1304_s6, 64, %s94_s25, [#allocation12]  }
  0x75   :  { %1046 = dma.done.wait [#allocation3], 4096  }
  0x76   :  { %1047 = vsyncadd [#allocation3], 4294963200 }
  0x77   :  { %1048 = dma.done.wait [#allocation6], 1024  }
  0x78   :  { %1049 = vsyncadd [#allocation6], 4294966272 }
  0x79   :  { %1050 = dma.done.wait [#allocation9], 2048  }
  0x7a   :  { %1051 = vsyncadd [#allocation9], 4294965248 }
  0x7b   :  { %1052 = dma.done.wait [#allocation12], 128  }
  0x7c   :  { %1053 = vsyncadd [#allocation12], 4294967168  ;;  %v1065_v0 = vmov 0   ;;  %vm178_vm0 = vcmask 48128   ;;  %v134_v2 = vld [vmem:[#allocation2 + $0x80] sm:$0xff]  ;;  %v135_v3 = vld [vmem:[#allocation2 + $0x88] sm:$0xff] }
  0x7d   :  { %868 = vset.pattern.permute.xlu0 %v1065_v0  ;;  %869 = vset.pattern.permute.xlu1 %v1065_v0  ;;  %vm1230_vm1 = vmpackc.low %vm178_vm0, %vm178_vm0  ;;  %v118_v4 = vld [vmem:[#allocation2] sm:$0xff]  ;;  %v784_v5 = vpack.c.bf16 %v135_v3, %v134_v2  ;;  %v119_v6 = vld [vmem:[#allocation2 + $0x8] sm:$0xff]  ;;  %v1066_v1 = vmov 0.0   ;;  %vm440_vm2 = vcmask 261120   ;;  %vm601_vm3 = vcmask 523264   ;;  %s1067_s6 = smov [#allocation14]  }
  0x7e   :  { %v136_v7 = vld [vmem:[#allocation2 + $0x90] sm:$0xff]  ;;  %v137_v8 = vld [vmem:[#allocation2 + $0x98] sm:$0xff]  ;;  %v787_v9 = vpack.c.bf16 %v119_v6, %v118_v4  ;;  %v138_v13 = vld [vmem:[#allocation2 + $0xa0] sm:$0xff]  ;;  %529 = vmatprep.mubr.f32.mxu1 %v1066_v1  ;;  %s687_s14 = sshll.u32 %s1067_s6, 4  ;;  %s688_s14 = int_to_ptr.vmem [resolvable:$true] %s687_s14 }
  0x7f   :  { %v790_v10 = vpack.c.bf16 %v137_v8, %v136_v7  ;;  %786 = vmatprep.subr.msk.bf16.mxu0 %vm1230_vm1, %v784_v5  ;;  %v120_v11 = vld [vmem:[#allocation2 + $0x10] sm:$0xff]  ;;  %v121_v12 = vld [vmem:[#allocation2 + $0x18] sm:$0xff]  ;;  %v139_v14 = vld [vmem:[#allocation2 + $0xa8] sm:$0xff]  ;;  %s1024_s8 = scalar_lea.vmem %s688_s14, 128  ;;  %p1029_p1 = scmp.lt.s32.totalorder %s688_s14, %s688_s14 }
  0x80   :  { %789 = vmatpush3.bf16.xpose.msk.msra.mxu0 %vm1230_vm1, %v787_v9  ;;  %v793_v15 = vpack.c.bf16 %v121_v12, %v120_v11  ;;  %v796_v16 = vpack.c.bf16 %v139_v14, %v138_v13  ;;  %v1240_v17 = vld [vmem:[#allocation5] sm:$0xff]  ;;  %v156_v19 = vld [vmem:[#allocation7 + $0x10] sm:$0xff]  ;;  %v123_v21 = vld [vmem:[#allocation2 + $0x28] sm:$0xff]  ;;  %p1025_p0 = scmp.ne.s32.totalorder %s688_s14, %s1024_s8  ;;  %p1030_p2 = scmp.lt.s32.totalorder %s1024_s8, %s1024_s8 }
  0x81   :  { %792 = vmatprep.subr.msk.bf16.mxu0 %vm1230_vm1, %v790_v10  ;;  %776 = vmatprep.mubr.msk.f32.mxu0 %vm178_vm0, %v1240_v17  ;;  %v154_v18 = vld [vmem:[#allocation7] sm:$0xff]  ;;  %v140_v22 = vld [vmem:[#allocation2 + $0xb0] sm:$0xff]  ;;  %v141_v23 = vld [vmem:[#allocation2 + $0xb8] sm:$0xff] }
  0x82   :  { %v122_v20 = vld [vmem:[#allocation2 + $0x20] sm:$0xff]  ;;  %160 = vperm.xlu0 %868, %v154_v18   ;;  %v155_v24 = vld [vmem:[#allocation7 + $0x8] sm:$0xff]  ;;  %170 = vperm.xlu1 %869, %v156_v19   ;;  %v157_v25 = vld [vmem:[#allocation7 + $0x18] sm:$0xff]  ;;  %v802_v27 = vpack.c.bf16 %v141_v23, %v140_v22  ;;  %p1031_p3 = por %p1030_p2, %p1029_p1 }
  0x83   :  { %v799_v26 = vpack.c.bf16 %v123_v21, %v122_v20  ;;  %v392_v28 = vld [vmem:[#allocation10] sm:$0xff]  ;;  %v393_v29 = vld [vmem:[#allocation10 + $0x8] sm:$0xff]  ;;  %v124_v30 = vld [vmem:[#allocation2 + $0x30] sm:$0xff] }
  0x84   :  { %v125_v31 = vld [vmem:[#allocation2 + $0x38] sm:$0xff]  ;;  %v142_v32 = vld [vmem:[#allocation2 + $0xc0] sm:$0xff]  ;;  %v143_v33 = vld [vmem:[#allocation2 + $0xc8] sm:$0xff]  ;;  %p1032_p4 = pnand %p1031_p3, %p1025_p0 }
  0x85   :  { %v394_v34 = vld [vmem:[#allocation10 + $0x10] sm:$0xff]  ;;  %v395_v35 = vld [vmem:[#allocation10 + $0x18] sm:$0xff]  ;;  %v805_v36 = vpack.c.bf16 %v125_v31, %v124_v30  ;;  %v808_v37 = vpack.c.bf16 %v143_v33, %v142_v32  ;;  %v396_v38 = vld [vmem:[#allocation10 + $0x20] sm:$0xff] }
  0x86   :  { %165 = vperm.xlu0 %868, %v155_v24   ;;  %175 = vperm.xlu1 %869, %v157_v25   ;;  %v397_v39 = vld [vmem:[#allocation10 + $0x28] sm:$0xff]  ;;  %v126_v40 = vld [vmem:[#allocation2 + $0x40] sm:$0xff]  ;;  %v144_v42 = vld [vmem:[#allocation2 + $0xd0] sm:$0xff] }
  0x87   :  { %v127_v41 = vld [vmem:[#allocation2 + $0x48] sm:$0xff]  ;;  %v145_v43 = vld [vmem:[#allocation2 + $0xd8] sm:$0xff]  ;;  %v398_v44 = vld [vmem:[#allocation10 + $0x30] sm:$0xff] }
  0x88   :  { %795 = vmatpush3.bf16.xpose.msk.msra.mxu0 %vm1230_vm1, %v793_v15  ;;  %v399_v45 = vld [vmem:[#allocation10 + $0x38] sm:$0xff]  ;;  %v811_v46 = vpack.c.bf16 %v127_v41, %v126_v40  ;;  %v814_v47 = vpack.c.bf16 %v145_v43, %v144_v42  ;;  %v595_v48 = vld [vmem:[#allocation13] sm:$0xf]  ;;  %v128_v49 = vld [vmem:[#allocation2 + $0x50] sm:$0xff] }
  0x89   :  { %798 = vmatprep.subr.msk.bf16.mxu0 %vm1230_vm1, %v796_v16  ;;  %v129_v50 = vld [vmem:[#allocation2 + $0x58] sm:$0xff]  ;;  %v146_v51 = vld [vmem:[#allocation2 + $0xe0] sm:$0xff]  ;;  %v147_v52 = vld [vmem:[#allocation2 + $0xe8] sm:$0xff] }
  0x8a   :  { %402 = vperm.xlu0 %868, %v392_v28   ;;  %407 = vperm.xlu1 %869, %v393_v29   ;;  %v817_v53 = vpack.c.bf16 %v129_v50, %v128_v49  ;;  %v820_v54 = vpack.c.bf16 %v147_v52, %v146_v51  ;;  %v130_v55 = vld [vmem:[#allocation2 + $0x60] sm:$0xff]  ;;  %v131_v56 = vld [vmem:[#allocation2 + $0x68] sm:$0xff]  ;;  %v148_v57 = vld [vmem:[#allocation2 + $0xf0] sm:$0xff] }
  0x8b   :  { %v149_v58 = vld [vmem:[#allocation2 + $0xf8] sm:$0xff]  ;;  %v823_v59 = vpack.c.bf16 %v131_v56, %v130_v55  ;;  %v132_v61 = vld [vmem:[#allocation2 + $0x70] sm:$0xff]  ;;  %v151_v0 = vld [vmem:[#allocation5 + $0x8] sm:$0xff] }
  0x8c   :  { %v826_v60 = vpack.c.bf16 %v149_v58, %v148_v57  ;;  %v133_v62 = vld [vmem:[#allocation2 + $0x78] sm:$0xff]  ;;  %v152_v2 = vld [vmem:[#allocation5 + $0x10] sm:$0xff]  ;;  %v388_v40 = vld [vmem:[#allocation8 + $0x20] sm:$0xff] }
  0x8d   :  { %v829_v63 = vpack.c.bf16 %v133_v62, %v132_v61  ;;  %v153_v3 = vld [vmem:[#allocation5 + $0x18] sm:$0xff]  ;;  %v389_v41 = vld [vmem:[#allocation8 + $0x28] sm:$0xff]  ;;  %v390_v42 = vld [vmem:[#allocation8 + $0x30] sm:$0xff] }
  0x8e   :  { %412 = vperm.xlu0 %868, %v394_v34   ;;  %417 = vperm.xlu1 %869, %v395_v35   ;;  %v391_v43 = vld [vmem:[#allocation8 + $0x38] sm:$0xff] }
  0x90   :  { %801 = vmatpush3.bf16.xpose.msk.msra.mxu0 %vm1230_vm1, %v799_v26 }
  0x91   :  { %804 = vmatprep.subr.msk.bf16.mxu0 %vm1230_vm1, %v802_v27 }
  0x92   :  { %422 = vperm.xlu0 %868, %v396_v38   ;;  %427 = vperm.xlu1 %869, %v397_v39   ;;  %v386_v38 = vld [vmem:[#allocation8 + $0x10] sm:$0xff]  ;;  %v387_v39 = vld [vmem:[#allocation8 + $0x18] sm:$0xff] }
  0x96   :  { %432 = vperm.xlu0 %868, %v398_v44   ;;  %437 = vperm.xlu1 %869, %v399_v45  }
  0x98   :  { %807 = vmatpush3.bf16.xpose.msk.msra.mxu0 %vm1230_vm1, %v805_v36  ;;  %v384_v36 = vld [vmem:[#allocation8] sm:$0xff] }
  0x99   :  { %810 = vmatprep.subr.msk.bf16.mxu0 %vm1230_vm1, %v808_v37  ;;  %v385_v37 = vld [vmem:[#allocation8 + $0x8] sm:$0xff] }
  0x9a   :  { %598 = vperm.xlu0 %868, %v595_v48  }
  0xa0   :  { %813 = vmatpush3.bf16.xpose.msk.msra.mxu0 %vm1230_vm1, %v811_v46 }
  0xa1   :  { %816 = vmatprep.subr.msk.bf16.mxu0 %vm1230_vm1, %v814_v47 }
  0xa8   :  { %819 = vmatpush3.bf16.xpose.msk.msra.mxu0 %vm1230_vm1, %v817_v53 }
  0xa9   :  { %822 = vmatprep.subr.msk.bf16.mxu0 %vm1230_vm1, %v820_v54 }
  0xb0   :  { %825 = vmatpush3.bf16.xpose.msk.msra.mxu0 %vm1230_vm1, %v823_v59 }
  0xb1   :  { %828 = vmatprep.subr.msk.bf16.mxu0 %vm1230_vm1, %v826_v60 }
  0xb8   :  { %831 = vmatpush3.bf16.xpose.msk.msra.mxu0 %vm1230_vm1, %v829_v63 }
  0xbf   :  { %777 = vmatmul.mubr.msk.f32.vlgmr.msra.gmra.mrb[0].mxu0 %vm178_vm0, %v1240_v17 }
  0xc0   :  { %778 = vmatprep.mubr.msk.f32.mxu0 %vm178_vm0, %v151_v0 }
  0xc3   :  { %779 = vmatmul.mubr.msk.f32.gmra.mrb[2].mxu0 %vm178_vm0, %v151_v0 }
  0xc4   :  { %780 = vmatprep.mubr.msk.f32.mxu0 %vm178_vm0, %v152_v2 }
  0xc7   :  { %781 = vmatmul.mubr.msk.f32.gmra.mrb[4].mxu0 %vm178_vm0, %v152_v2 }
  0xc8   :  { %782 = vmatprep.mubr.msk.f32.mxu0 %vm178_vm0, %v153_v3 }
  0xcb   :  { %783 = vmatmul.mubr.msk.f32.gmra.mrb[6].mxu0 %vm178_vm0, %v153_v3 }
 0x101   :  { %v161_v4 = vpop.permute.xlu0 %160  ;;  %v171_v13 = vpop.permute.xlu1 %170 }
 0x105   :  { %v166_v8 = vpop.permute.xlu0 %165  ;;  %v176_v24 = vpop.permute.xlu1 %175 }
 0x109   :  { %v403_v46 = vpop.permute.xlu0 %402  ;;  %v408_v48 = vpop.permute.xlu1 %407 }
 0x10d   :  { %v413_v61 = vpop.permute.xlu0 %412  ;;  %v418_v0 = vpop.permute.xlu1 %417 }
 0x192   :  { %v353_v5 = vpop.f32.mrb[0].mxu0 }
 0x193   :  { %v355_v6 = vpop.f32.mrb[1].mxu0  ;;  %v354_v7 = vadd.f32 %v353_v5, %v161_v4 }
 0x194   :  { %v356_v9 = vadd.f32 %v355_v6, %v161_v4 }
 0x195   :  { %v376_v15 = vmax.f32 %v354_v7, 0.0 }
 0x196   :  { %v359_v10 = vpop.f32.mrb[2].mxu0  ;;  %v377_v17 = vmax.f32 %v356_v9, 0.0 }
 0x197   :  { %v360_v11 = vadd.f32 %v359_v10, %v166_v8  ;;  %v361_v12 = vpop.f32.mrb[3].mxu0 }
 0x198   :  { %v362_v14 = vadd.f32 %v361_v12, %v166_v8 }
 0x199   :  { %v378_v16 = vmax.f32 %v360_v11, 0.0 }
 0x19a   :  { %v379_v18 = vmax.f32 %v362_v14, 0.0  ;;  %v365_v19 = vpop.f32.mrb[4].mxu0 }
 0x19b   :  { %v367_v20 = vpop.f32.mrb[5].mxu0  ;;  %v834_v21 = vpack.c.bf16 %v378_v16, %v376_v15  ;;  %v366_v23 = vadd.f32 %v365_v19, %v171_v13  ;;  %v428_v16 = vpop.permute.xlu1 %427 }
 0x19c   :  { %v832_v22 = vpack.c.bf16 %v379_v18, %v377_v17  ;;  %v368_v25 = vadd.f32 %v367_v20, %v171_v13  ;;  %v423_v13 = vpop.permute.xlu0 %422 }
 0x19d   :  { %v380_v30 = vmax.f32 %v366_v23, 0.0 }
 0x19e   :  { %v371_v26 = vpop.f32.mrb[6].mxu0  ;;  %833 = vmatprep.subr.bf16.mxu1 %v832_v22  ;;  %v381_v32 = vmax.f32 %v368_v25, 0.0 }
 0x19f   :  { %v372_v27 = vadd.f32 %v371_v26, %v176_v24  ;;  %v373_v28 = vpop.f32.mrb[7].mxu0  ;;  %835 = vmatpush1.bf16.msra.mxu1 %v834_v21 }
 0x1a0   :  { %v374_v29 = vadd.f32 %v373_v28, %v176_v24 }
 0x1a1   :  { %v382_v31 = vmax.f32 %v372_v27, 0.0 }
 0x1a2   :  { %v383_v33 = vmax.f32 %v374_v29, 0.0  ;;  %v433_v29 = vpop.permute.xlu0 %432 }
 0x1a3   :  { %v838_v34 = vpack.c.bf16 %v382_v31, %v380_v30 }
 0x1a4   :  { %v836_v35 = vpack.c.bf16 %v383_v33, %v381_v32  ;;  %v438_v32 = vpop.permute.xlu1 %437 }
 0x1a6   :  { %837 = vmatprep.subr.bf16.mxu1 %v836_v35 }
 0x1a7   :  { %839 = vmatpush1.bf16.msra.mxu1 %v838_v34 }
 0x1aa   :  { %735 = vmatmul.mubr.msk.f32.vlgmr.msra.gmra.mrb[0].mxu1 %vm440_vm2, %v384_v36 }
 0x1ab   :  { %535 = vmatprep.mubr.f32.mxu1 %v1066_v1 }
 0x1ae   :  { %736 = vmatmul.mubr.msk.f32.gmra.mrb[2].mxu1 %vm440_vm2, %v385_v37 }
 0x1af   :  { %541 = vmatprep.mubr.f32.mxu1 %v1066_v1 }
 0x1b2   :  { %737 = vmatmul.mubr.msk.f32.gmra.mrb[4].mxu1 %vm440_vm2, %v386_v38 }
 0x1b3   :  { %547 = vmatprep.mubr.f32.mxu1 %v1066_v1 }
 0x1b6   :  { %738 = vmatmul.mubr.msk.f32.gmra.mrb[6].mxu1 %vm440_vm2, %v387_v39 }
 0x1b7   :  { %553 = vmatprep.mubr.f32.mxu1 %v1066_v1 }
 0x1ba   :  { %739 = vmatmul.mubr.msk.f32.gmra.mrb[8].mxu1 %vm440_vm2, %v388_v40 }
 0x1bb   :  { %559 = vmatprep.mubr.f32.mxu1 %v1066_v1 }
 0x1be   :  { %740 = vmatmul.mubr.msk.f32.gmra.mrb[10].mxu1 %vm440_vm2, %v389_v41 }
 0x1bf   :  { %565 = vmatprep.mubr.f32.mxu1 %v1066_v1 }
 0x1c2   :  { %741 = vmatmul.mubr.msk.f32.gmra.mrb[12].mxu1 %vm440_vm2, %v390_v42 }
 0x1c3   :  { %571 = vmatprep.mubr.f32.mxu1 %v1066_v1 }
 0x1c6   :  { %742 = vmatmul.mubr.msk.f32.gmra.mrb[14].mxu1 %vm440_vm2, %v391_v43 }
 0x1c7   :  { %669 = vmatprep.mubr.f32.mxu1 %v1066_v1 }
 0x27d   :  { %v531_v44 = vpop.f32.mrb[0].mxu1 }
 0x27e   :  { %v533_v45 = vpop.f32.mrb[1].mxu1  ;;  %v532_v47 = vadd.f32 %v531_v44, %v403_v46  ;;  %v594_v44 = vld [vmem:[#allocation11] sm:$0xf] }
 0x27f   :  { %v534_v49 = vadd.f32 %v533_v45, %v403_v46  ;;  %v599_v45 = vpop.permute.xlu0 %598 }
 0x280   :  { %v578_v54 = vmax.f32 %v532_v47, 0.0 }
 0x281   :  { %v537_v50 = vpop.f32.mrb[2].mxu1  ;;  %v579_v56 = vmax.f32 %v534_v49, 0.0 }
 0x282   :  { %v538_v51 = vadd.f32 %v537_v50, %v408_v48  ;;  %v539_v52 = vpop.f32.mrb[3].mxu1 }
 0x283   :  { %v540_v53 = vadd.f32 %v539_v52, %v408_v48 }
 0x284   :  { %v580_v55 = vmax.f32 %v538_v51, 0.0 }
 0x285   :  { %v581_v57 = vmax.f32 %v540_v53, 0.0  ;;  %v543_v58 = vpop.f32.mrb[4].mxu1 }
 0x286   :  { %v842_v59 = vpack.c.bf16 %v580_v55, %v578_v54  ;;  %v545_v60 = vpop.f32.mrb[5].mxu1  ;;  %v544_v63 = vadd.f32 %v543_v58, %v413_v61 }
 0x287   :  { %v840_v62 = vpack.c.bf16 %v581_v57, %v579_v56  ;;  %v546_v2 = vadd.f32 %v545_v60, %v413_v61 }
 0x288   :  { %v582_v6 = vmax.f32 %v544_v63, 0.0 }
 0x289   :  { %v549_v3 = vpop.f32.mrb[6].mxu1  ;;  %841 = vmatprep.subr.bf16.mxu1 %v840_v62  ;;  %v583_v8 = vmax.f32 %v546_v2, 0.0 }
 0x28a   :  { %v550_v1 = vadd.f32 %v549_v3, %v418_v0  ;;  %v551_v4 = vpop.f32.mrb[7].mxu1  ;;  %843 = vmatpush1.bf16.msra.mxu1 %v842_v59 }
 0x28b   :  { %v552_v5 = vadd.f32 %v551_v4, %v418_v0 }
 0x28c   :  { %v584_v7 = vmax.f32 %v550_v1, 0.0 }
 0x28d   :  { %v585_v9 = vmax.f32 %v552_v5, 0.0  ;;  %v555_v10 = vpop.f32.mrb[8].mxu1 }
 0x28e   :  { %v846_v11 = vpack.c.bf16 %v584_v7, %v582_v6  ;;  %v557_v12 = vpop.f32.mrb[9].mxu1  ;;  %v556_v15 = vadd.f32 %v555_v10, %v423_v13 }
 0x28f   :  { %v844_v14 = vpack.c.bf16 %v585_v9, %v583_v8  ;;  %v558_v17 = vadd.f32 %v557_v12, %v423_v13 }
 0x290   :  { %v586_v22 = vmax.f32 %v556_v15, 0.0 }
 0x291   :  { %v561_v18 = vpop.f32.mrb[10].mxu1  ;;  %845 = vmatprep.subr.bf16.mxu1 %v844_v14  ;;  %v587_v24 = vmax.f32 %v558_v17, 0.0 }
 0x292   :  { %v562_v19 = vadd.f32 %v561_v18, %v428_v16  ;;  %v563_v20 = vpop.f32.mrb[11].mxu1  ;;  %847 = vmatpush1.bf16.msra.mxu1 %v846_v11 }
 0x293   :  { %v564_v21 = vadd.f32 %v563_v20, %v428_v16 }
 0x294   :  { %v588_v23 = vmax.f32 %v562_v19, 0.0 }
 0x295   :  { %v589_v25 = vmax.f32 %v564_v21, 0.0  ;;  %v567_v26 = vpop.f32.mrb[12].mxu1 }
 0x296   :  { %v850_v27 = vpack.c.bf16 %v588_v23, %v586_v22  ;;  %v569_v28 = vpop.f32.mrb[13].mxu1  ;;  %v568_v31 = vadd.f32 %v567_v26, %v433_v29 }
 0x297   :  { %v848_v30 = vpack.c.bf16 %v589_v25, %v587_v24  ;;  %v570_v33 = vadd.f32 %v569_v28, %v433_v29 }
 0x298   :  { %v590_v38 = vmax.f32 %v568_v31, 0.0 }
 0x299   :  { %v573_v34 = vpop.f32.mrb[14].mxu1  ;;  %849 = vmatprep.subr.bf16.mxu1 %v848_v30  ;;  %v591_v40 = vmax.f32 %v570_v33, 0.0 }
 0x29a   :  { %v574_v35 = vadd.f32 %v573_v34, %v438_v32  ;;  %v575_v36 = vpop.f32.mrb[15].mxu1  ;;  %851 = vmatpush1.bf16.msra.mxu1 %v850_v27 }
 0x29b   :  { %v576_v37 = vadd.f32 %v575_v36, %v438_v32 }
 0x29c   :  { %v592_v39 = vmax.f32 %v574_v35, 0.0 }
 0x29d   :  { %v593_v41 = vmax.f32 %v576_v37, 0.0 }
 0x29e   :  { %v854_v42 = vpack.c.bf16 %v592_v39, %v590_v38 }
 0x29f   :  { %v852_v43 = vpack.c.bf16 %v593_v41, %v591_v40 }
 0x2a1   :  { %853 = vmatprep.subr.bf16.mxu1 %v852_v43 }
 0x2a2   :  { %855 = vmatpush1.bf16.msra.mxu1 %v854_v42 }
 0x2a5   :  { %743 = vmatmul.mubr.msk.f32.vlgmr.msra.gmra.mrb[16].mxu1 %vm601_vm3, %v594_v44 }
 0x378   :  { %v671_v46 = vpop.f32.mrb[16].mxu1 }
 0x379   :  { %v672_v47 = vadd.f32 %v671_v46, %v599_v45  ;;  %v673_v48 = vpop.f32.mrb[17].mxu1 }
 0x37a   :  { %v674_v49 = vadd.f32 %v673_v48, %v599_v45 }
 0x37c   :  { %v678_v50 = vcombine.low %v672_v47, %v674_v49 }
 0x37e   :  { %680 = vst [vmem:[#allocation14] sm:$0xff] %v678_v50 }
 0x37f   :  { %1035 = shalt.err (!%p1032_p4)
}
 0x380   :  { %s1036_s0 = scalar_lea.hbm %s1305_s7, 128 }
 0x381   :  { %p1037_p5 = scmp.ne.s32.totalorder %s1305_s7, %s1036_s0  ;;  %p1040_p6 = scmp.lt.u32.totalorder %s1036_s0, %s1305_s7 }
 0x383   :  { %p1042_p7 = pnand %p1040_p6, %p1037_p5 }
 0x385   :  { %1045 = shalt.err (!%p1042_p7)
}
 0x386   :  { %690 = dma.vmem_to_hbm [thread:$0]  %s688_s14, 128, %s1305_s7, [#allocation4]  }
 0x387   :  { %1054 = dma.done.wait [#allocation4], 128  }
 0x388   :  { %1055 = vsyncadd [#allocation4], 4294967168 }
 0x389   :  { %694 = vsyncpa [#allocation3], 1 }
 0x38a   :  { %695 = vsyncpa [#allocation6], 1 }
 0x38b   :  { %696 = vsyncpa [#allocation9], 1 }
 0x38c   :  { %697 = vsyncpa [#allocation12], 1 }
 0x38d   :  { %698 = vsyncpa [#allocation4], 1 }

</bundles_post_ra>
